<compile_context>
chip_gen: v7x
topology: tpu7x:2x2x1
jax: 0.10.0
libtpu: 0.0.40
codegen_flags: <defaults>
</compile_context>

<pallas_src>
import functools

import jax
import jax.numpy as jnp
from jax.experimental import pallas as pl
from jax.experimental.pallas import tpu as pltpu


LANE = 128     # lane width: hidden dims zero-padded to a multiple of this
SUBLANE = 8    # batch tiles must be a multiple of the sublane count
MXU_M = 256    # preferred batch-tile alignment for large tiles (v6e/v7x MXU M)


def _round_up(n, m):
    return ((n + m - 1) // m) * m


# ---------------------------------------------------------------------------
# Kernel
# ---------------------------------------------------------------------------
def qnetwork_kernel(x_ref,
                    w1_ref, b1_ref,
                    w2_ref, b2_ref,
                    w3_ref, b3_ref,
                    w4_ref, b4_ref,
                    out_ref):
    """One batch tile of the fused 4-layer MLP.

    MXU inputs ride in the weights' dtype (bf16 by default); accumulation,
    bias add and ReLU are f32 (v5e-friendly), and the activation is cast back
    to bf16 in the same expression so no standalone f32 (tm, hidden) tensor is
    carried between layers.
    """
    mm = w1_ref.dtype

    h = jnp.maximum(
        jnp.dot(x_ref[...].astype(mm), w1_ref[...],
                preferred_element_type=jnp.float32) + b1_ref[...],
        0.0).astype(mm)
    h = jnp.maximum(
        jnp.dot(h, w2_ref[...],
                preferred_element_type=jnp.float32) + b2_ref[...],
        0.0).astype(mm)
    h = jnp.maximum(
        jnp.dot(h, w3_ref[...],
                preferred_element_type=jnp.float32) + b3_ref[...],
        0.0).astype(mm)

    # Final layer: narrow (tm, out_dim) f32 store -- minimal HBM writeback,
    # exact PyTorch output dtype/shape, no padded columns to slice off.
    out_ref[...] = (jnp.dot(h, w4_ref[...], preferred_element_type=jnp.float32)
                    + b4_ref[...]).astype(out_ref.dtype)


# ---------------------------------------------------------------------------
# One-time parameter preparation
# ---------------------------------------------------------------------------
def prepare_params(params, *, use_bf16=True):
    """One-time layout prep (NOT per forward call):
      * transpose PyTorch (out, in) weights to (in, out); biases to (1, out)
      * zero-pad hidden dims to a multiple of 128 lanes (mathematically exact:
        padded activations are identically zero through every layer)
      * cast weights to bf16 for the MXU; biases stay f32 (f32 accumulate)
    The input dim and the true output dim are NOT padded: x is fed as-is and
    the final store is a narrow (batch, out_dim) f32 write.
    """
    w_dtype = jnp.bfloat16 if use_bf16 else jnp.float32
    in_dim = params["w1"].shape[1]
    hidden = params["w1"].shape[0]
    out_dim = params["w4"].shape[0]
    hidden_pad = _round_up(hidden, LANE)

    def prep(w, b, pad_in, pad_out):
        w = w.T.astype(jnp.float32)                 # (in, out)
        b = b.reshape(1, -1).astype(jnp.float32)    # (1, out)
        w = jnp.pad(w, ((0, pad_in - w.shape[0]), (0, pad_out - w.shape[1])))
        b = jnp.pad(b, ((0, 0), (0, pad_out - b.shape[1])))
        return w.astype(w_dtype), b                 # weights bf16, biases f32

    p = {}
    p["w1"], p["b1"] = prep(params["w1"], params["b1"], in_dim, hidden_pad)
    p["w2"], p["b2"] = prep(params["w2"], params["b2"], hidden_pad, hidden_pad)
    p["w3"], p["b3"] = prep(params["w3"], params["b3"], hidden_pad, hidden_pad)
    p["w4"], p["b4"] = prep(params["w4"], params["b4"], hidden_pad, out_dim)
    return p


# ---------------------------------------------------------------------------
# Wrapper helpers
# ---------------------------------------------------------------------------
def _vmem_capacity_bytes():
    try:
        info = pltpu.get_tpu_info()
        return int(getattr(info, "vmem_capacity_bytes", 64 * 1024 * 1024))
    except Exception:
        return 64 * 1024 * 1024   # conservative (v7x per-TC)


@functools.lru_cache(maxsize=None)
def _single_buffer_supported():
    """Probe once whether pipeline_mode=pl.Buffered(1) lowers on this stack."""
    try:
        spec = pl.BlockSpec((SUBLANE, LANE), lambda i: (0, 0),
                            pipeline_mode=pl.Buffered(buffer_count=1))

        def _probe(a_ref, o_ref):
            o_ref[...] = a_ref[...] + 1.0

        out = pl.pallas_call(
            _probe,
            out_shape=jax.ShapeDtypeStruct((SUBLANE, LANE), jnp.float32),
            grid=(1,),
            in_specs=[spec],
            out_specs=pl.BlockSpec((SUBLANE, LANE), lambda i: (0, 0)),
        )(jnp.zeros((SUBLANE, LANE), jnp.float32))
        jax.block_until_ready(out)
        return True
    except Exception:
        return False


def _choose_tm(batch, tm_max):
    """Batch-tile rows: sublane-aligned (MXU_M-aligned when large), with
    ragged-tile waste bounded by splitting the batch evenly across tiles."""
    tm_max = max(SUBLANE, tm_max - tm_max % SUBLANE)
    if batch <= tm_max:
        return _round_up(batch, SUBLANE)
    n_tiles = -(-batch // tm_max)
    tm = -(-batch // n_tiles)                 # even split across tiles
    align = MXU_M if tm >= MXU_M else SUBLANE
    return min(_round_up(tm, align), _round_up(tm_max, align))


# ---------------------------------------------------------------------------
# Fused forward
# ---------------------------------------------------------------------------
def qnetwork_forward(x, prepped, *, tm_max=8192):
    """Fused QNetwork forward. x: (batch, input_dim) -> (batch, output_dim) f32."""
    if x.dtype != jnp.float32:          # mirrors x.float(); no-op for f32 inputs
        x = x.astype(jnp.float32)
    batch, in_dim = x.shape

    w1, b1 = prepped["w1"], prepped["b1"]
    w2, b2 = prepped["w2"], prepped["b2"]
    w3, b3 = prepped["w3"], prepped["b3"]
    w4, b4 = prepped["w4"], prepped["b4"]
    assert w1.shape[0] == in_dim, "input_dim mismatch with prepared params"
    hidden_pad = w2.shape[0]
    out_dim = w4.shape[1]

    params = (w1, b1, w2, b2, w3, b3, w4, b4)
    weight_bytes = sum(int(a.size) * a.dtype.itemsize for a in params)

    single_buffer = _single_buffer_supported()
    buf_factor = 1 if single_buffer else 2

    # Per-generation VMEM budget: v7x (64 MiB) -> ~48 MiB, v5e/v6e (128 MiB) -> ~96 MiB.
    vmem_limit = min(int(0.75 * _vmem_capacity_bytes()), 100 * 1024 * 1024)

    # Rough VMEM bytes per batch row: double-buffered f32 x and out tiles
    # (lane-padded to 128 in VMEM) plus ~3 live (row, hidden_pad) f32 temporaries.
    bytes_per_row = (2 * _round_up(in_dim, LANE) * 4
                     + 2 * _round_up(out_dim, LANE) * 4
                     + 3 * hidden_pad * 4)
    tm_cap = (vmem_limit - buf_factor * weight_bytes) // bytes_per_row
    tm_cap = max(SUBLANE, (tm_cap // SUBLANE) * SUBLANE)
    tm = _choose_tm(batch, min(tm_max, tm_cap))
    grid = (pl.cdiv(batch, tm),)          # ragged last tile: OOB writes masked

    cost = pl.CostEstimate(
        flops=2 * batch * (in_dim * hidden_pad + 2 * hidden_pad * hidden_pad
                           + hidden_pad * out_dim),
        transcendentals=0,
        bytes_accessed=int(x.size) * 4 + batch * out_dim * 4 + weight_bytes)

    def pinned(a):
        # Constant index_map keeps weights resident across the whole grid;
        # Buffered(1) avoids allocating a useless second buffer for them.
        if single_buffer:
            return pl.BlockSpec(a.shape, lambda i: (0, 0),
                                pipeline_mode=pl.Buffered(buffer_count=1))
        return pl.BlockSpec(a.shape, lambda i: (0, 0))

    return pl.pallas_call(
        qnetwork_kernel,
        out_shape=jax.ShapeDtypeStruct((batch, out_dim), jnp.float32),
        grid=grid,
        in_specs=[pl.BlockSpec((tm, in_dim), lambda i: (i, 0)),
                  pinned(w1), pinned(b1),
                  pinned(w2), pinned(b2),
                  pinned(w3), pinned(b3),
                  pinned(w4), pinned(b4)],
        out_specs=pl.BlockSpec((tm, out_dim), lambda i: (i, 0)),
        compiler_params=pltpu.CompilerParams(
            # TODO(synk): verify on v7x (xprof) that the "parallel" batch axis
            # actually feeds both TensorCores; switch to CORE_PARALLEL if not.
            dimension_semantics=("parallel",),
            vmem_limit_bytes=int(vmem_limit)),
        cost_estimate=cost,
    )(x, *params)


# ---------------------------------------------------------------------------
# Init / reference (pure JAX)
# ---------------------------------------------------------------------------
def init_params(key, input_dim, hidden_dim, output_dim):
    """Deterministic init mimicking nn.Linear default (uniform +/- 1/sqrt(fan_in))."""
    dims = [(hidden_dim, input_dim),
            (hidden_dim, hidden_dim),
            (hidden_dim, hidden_dim),
            (output_dim, hidden_dim)]
    params = {}
    for i, (out_f, in_f) in enumerate(dims, start=1):
        key, kw, kb = jax.random.split(key, 3)
        bound = 1.0 / (in_f ** 0.5)
        params[f"w{i}"] = jax.random.uniform(
            kw, (out_f, in_f), jnp.float32, minval=-bound, maxval=bound)
        params[f"b{i}"] = jax.random.uniform(
            kb, (out_f,), jnp.float32, minval=-bound, maxval=bound)
    return params


def reference_forward(x, params):
    h = x.astype(jnp.float32)
    for i in range(1, 4):
        h = jnp.maximum(h @ params[f"w{i}"].T + params[f"b{i}"], 0.0)
    return h @ params["w4"].T + params["b4"]


if __name__ == "__main__":
    batch, input_dim, hidden_dim, output_dim = 8, 16, 32, 4

    key = jax.random.PRNGKey(0)
    key, kx = jax.random.split(key)
    x = jax.random.normal(kx, (batch, input_dim), jnp.float32)
    params = init_params(key, input_dim, hidden_dim, output_dim)

    # One-time parameter prep (transpose, pad hidden to 128, cast) -- reused.
    prepped = prepare_params(params, use_bf16=True)

    out = jax.block_until_ready(qnetwork_forward(x, prepped))
    ref = reference_forward(x, params)
    assert out.shape == (batch, output_dim)
    # bf16 MXU inputs with f32 accumulation -> loosened tolerance vs f32 ref.
    assert jnp.allclose(out, ref, atol=5e-2, rtol=5e-2), "mismatch (bf16 path)"

    # Exercise the ragged multi-tile path (batch not a multiple of tm).
    key, kx2 = jax.random.split(key)
    x2 = jax.random.normal(kx2, (300, input_dim), jnp.float32)
    out2 = jax.block_until_ready(qnetwork_forward(x2, prepped, tm_max=128))
    ref2 = reference_forward(x2, params)
    assert out2.shape == (300, output_dim)
    assert jnp.allclose(out2, ref2, atol=5e-2, rtol=5e-2), "mismatch (tiled path)"

    print("KERNEL_OK")
</pallas_src>

<mosaic_0001>
module attributes {stable_mosaic.version = 11 : i64} {
  func.func @_probe(%arg0: i32, %arg1: memref<8x128xf32, #tpu.memory_space<vmem>>, %arg2: memref<8x128xf32, #tpu.memory_space<vmem>>) attributes {dimension_semantics = [#tpu.dimension_semantics<arbitrary>], iteration_bounds = array<i64: 1>, scalar_prefetch = 0 : i64, scratch_operands = 0 : i64, tpu.core_type = #tpu.core_type<tc>, window_params = [{pipeline_mode = #tpu.pipeline_mode<synchronous>, transform_indices = @transform_0, window_bounds = array<i64: 8, 128>}, {pipeline_mode = #tpu.pipeline_mode<synchronous>, transform_indices = @transform_1, window_bounds = array<i64: 8, 128>}]} {
    %c0 = arith.constant 0 : index
    %c0_0 = arith.constant 0 : index
    %0 = vector.load %arg1[%c0, %c0_0] : memref<8x128xf32, #tpu.memory_space<vmem>>, vector<8x128xf32>
    %cst = arith.constant 1.000000e+00 : f32
    %1 = vector.broadcast %cst : f32 to vector<8x128xf32>
    %2 = arith.addf %0, %1 : vector<8x128xf32>
    %c0_1 = arith.constant 0 : index
    %c0_2 = arith.constant 0 : index
    %3 = vector.load %arg2[%c0_1, %c0_2] : memref<8x128xf32, #tpu.memory_space<vmem>>, vector<8x128xf32>
    tpu.vector_store %arg2[%c0_1, %c0_2], %2 {strides = array<i32>} : memref<8x128xf32, #tpu.memory_space<vmem>>, vector<8x128xf32>,
    return
  }
  func.func @transform_0(%arg0: i32) -> (i32, i32) {
    %c0_i32 = arith.constant 0 : i32
    %c0_i32_0 = arith.constant 0 : i32
    %c0_i32_1 = arith.constant 0 : i32
    return %c0_i32, %c0_i32_0 : i32, i32
  }
  func.func @transform_1(%arg0: i32) -> (i32, i32) {
    %c0_i32 = arith.constant 0 : i32
    %c0_i32_0 = arith.constant 0 : i32
    %c0_i32_1 = arith.constant 0 : i32
    return %c0_i32, %c0_i32_0 : i32, i32
  }
}

module attributes {stable_mosaic.version = 11 : i64} {
  func.func @qnetwork_kernel(%arg0: i32, %arg1: memref<8x16xf32, #tpu.memory_space<vmem>>, %arg2: memref<16x128xbf16, #tpu.memory_space<vmem>>, %arg3: memref<1x128xf32, #tpu.memory_space<vmem>>, %arg4: memref<128x128xbf16, #tpu.memory_space<vmem>>, %arg5: memref<1x128xf32, #tpu.memory_space<vmem>>, %arg6: memref<128x128xbf16, #tpu.memory_space<vmem>>, %arg7: memref<1x128xf32, #tpu.memory_space<vmem>>, %arg8: memref<128x4xbf16, #tpu.memory_space<vmem>>, %arg9: memref<1x4xf32, #tpu.memory_space<vmem>>, %arg10: memref<8x4xf32, #tpu.memory_space<vmem>>) attributes {dimension_semantics = [#tpu.dimension_semantics<parallel>], iteration_bounds = array<i64: 1>, scalar_prefetch = 0 : i64, scratch_operands = 0 : i64, tpu.core_type = #tpu.core_type<tc>, window_params = [{transform_indices = @transform_0, window_bounds = array<i64: 8, 16>}, {pipeline_mode = #tpu.pipeline_mode<synchronous>, transform_indices = @transform_1, window_bounds = array<i64: 16, 128>}, {pipeline_mode = #tpu.pipeline_mode<synchronous>, transform_indices = @transform_2, window_bounds = array<i64: 1, 128>}, {pipeline_mode = #tpu.pipeline_mode<synchronous>, transform_indices = @transform_3, window_bounds = array<i64: 128, 128>}, {pipeline_mode = #tpu.pipeline_mode<synchronous>, transform_indices = @transform_4, window_bounds = array<i64: 1, 128>}, {pipeline_mode = #tpu.pipeline_mode<synchronous>, transform_indices = @transform_5, window_bounds = array<i64: 128, 128>}, {pipeline_mode = #tpu.pipeline_mode<synchronous>, transform_indices = @transform_6, window_bounds = array<i64: 1, 128>}, {pipeline_mode = #tpu.pipeline_mode<synchronous>, transform_indices = @transform_7, window_bounds = array<i64: 128, 4>}, {pipeline_mode = #tpu.pipeline_mode<synchronous>, transform_indices = @transform_8, window_bounds = array<i64: 1, 4>}, {transform_indices = @transform_9, window_bounds = array<i64: 8, 4>}]} {
    %c0 = arith.constant 0 : index
    %c0_0 = arith.constant 0 : index
    %0 = vector.load %arg1[%c0, %c0_0] : memref<8x16xf32, #tpu.memory_space<vmem>>, vector<8x16xf32>
    %1 = arith.truncf %0 : vector<8x16xf32> to vector<8x16xbf16>
    %c0_1 = arith.constant 0 : index
    %c0_2 = arith.constant 0 : index
    %2 = vector.load %arg2[%c0_1, %c0_2] : memref<16x128xbf16, #tpu.memory_space<vmem>>, vector<16x128xbf16>
    %cst = arith.constant dense<0.000000e+00> : vector<8x128xf32>
    %3 = tpu.matmul %1, %2, %cst {dimension_numbers = #tpu.dot_dimension_numbers<[1], [0], [0], [1], [0, 0, 1, 1], [], []>} : vector<8x16xbf16>, vector<16x128xbf16>, vector<8x128xf32> -> vector<8x128xf32>
    %c0_3 = arith.constant 0 : index
    %c0_4 = arith.constant 0 : index
    %4 = vector.load %arg3[%c0_3, %c0_4] : memref<1x128xf32, #tpu.memory_space<vmem>>, vector<1x128xf32>
    %5 = vector.broadcast %4 : vector<1x128xf32> to vector<8x128xf32>
    %6 = arith.addf %3, %5 : vector<8x128xf32>
    %cst_5 = arith.constant 0.000000e+00 : f32
    %7 = vector.broadcast %cst_5 : f32 to vector<8x128xf32>
    %8 = arith.maximumf %6, %7 : vector<8x128xf32>
    %9 = arith.truncf %8 : vector<8x128xf32> to vector<8x128xbf16>
    %c0_6 = arith.constant 0 : index
    %c0_7 = arith.constant 0 : index
    %10 = vector.load %arg4[%c0_6, %c0_7] : memref<128x128xbf16, #tpu.memory_space<vmem>>, vector<128x128xbf16>
    %cst_8 = arith.constant dense<0.000000e+00> : vector<8x128xf32>
    %11 = tpu.matmul %9, %10, %cst_8 {dimension_numbers = #tpu.dot_dimension_numbers<[1], [0], [0], [1], [0, 0, 1, 1], [], []>} : vector<8x128xbf16>, vector<128x128xbf16>, vector<8x128xf32> -> vector<8x128xf32>
    %c0_9 = arith.constant 0 : index
    %c0_10 = arith.constant 0 : index
    %12 = vector.load %arg5[%c0_9, %c0_10] : memref<1x128xf32, #tpu.memory_space<vmem>>, vector<1x128xf32>
    %13 = vector.broadcast %12 : vector<1x128xf32> to vector<8x128xf32>
    %14 = arith.addf %11, %13 : vector<8x128xf32>
    %cst_11 = arith.constant 0.000000e+00 : f32
    %15 = vector.broadcast %cst_11 : f32 to vector<8x128xf32>
    %16 = arith.maximumf %14, %15 : vector<8x128xf32>
    %17 = arith.truncf %16 : vector<8x128xf32> to vector<8x128xbf16>
    %c0_12 = arith.constant 0 : index
    %c0_13 = arith.constant 0 : index
    %18 = vector.load %arg6[%c0_12, %c0_13] : memref<128x128xbf16, #tpu.memory_space<vmem>>, vector<128x128xbf16>
    %cst_14 = arith.constant dense<0.000000e+00> : vector<8x128xf32>
    %19 = tpu.matmul %17, %18, %cst_14 {dimension_numbers = #tpu.dot_dimension_numbers<[1], [0], [0], [1], [0, 0, 1, 1], [], []>} : vector<8x128xbf16>, vector<128x128xbf16>, vector<8x128xf32> -> vector<8x128xf32>
    %c0_15 = arith.constant 0 : index
    %c0_16 = arith.constant 0 : index
    %20 = vector.load %arg7[%c0_15, %c0_16] : memref<1x128xf32, #tpu.memory_space<vmem>>, vector<1x128xf32>
    %21 = vector.broadcast %20 : vector<1x128xf32> to vector<8x128xf32>
    %22 = arith.addf %19, %21 : vector<8x128xf32>
    %cst_17 = arith.constant 0.000000e+00 : f32
    %23 = vector.broadcast %cst_17 : f32 to vector<8x128xf32>
    %24 = arith.maximumf %22, %23 : vector<8x128xf32>
    %25 = arith.truncf %24 : vector<8x128xf32> to vector<8x128xbf16>
    %c0_18 = arith.constant 0 : index
    %c0_19 = arith.constant 0 : index
    %26 = vector.load %arg8[%c0_18, %c0_19] : memref<128x4xbf16, #tpu.memory_space<vmem>>, vector<128x4xbf16>
    %cst_20 = arith.constant dense<0.000000e+00> : vector<8x4xf32>
    %27 = tpu.matmul %25, %26, %cst_20 {dimension_numbers = #tpu.dot_dimension_numbers<[1], [0], [0], [1], [0, 0, 1, 1], [], []>} : vector<8x128xbf16>, vector<128x4xbf16>, vector<8x4xf32> -> vector<8x4xf32>
    %c0_21 = arith.constant 0 : index
    %c0_22 = arith.constant 0 : index
    %28 = vector.load %arg9[%c0_21, %c0_22] : memref<1x4xf32, #tpu.memory_space<vmem>>, vector<1x4xf32>
    %29 = vector.broadcast %28 : vector<1x4xf32> to vector<8x4xf32>
    %30 = arith.addf %27, %29 : vector<8x4xf32>
    %c0_23 = arith.constant 0 : index
    %c0_24 = arith.constant 0 : index
    %31 = vector.load %arg10[%c0_23, %c0_24] : memref<8x4xf32, #tpu.memory_space<vmem>>, vector<8x4xf32>
    tpu.vector_store %arg10[%c0_23, %c0_24], %30 {strides = array<i32>} : memref<8x4xf32, #tpu.memory_space<vmem>>, vector<8x4xf32>,
    return
  }
  func.func @transform_0(%arg0: i32) -> (i32, i32) {
    %c0_i32 = arith.constant 0 : i32
    %c0_i32_0 = arith.constant 0 : i32
    return %arg0, %c0_i32 : i32, i32
  }
  func.func @transform_1(%arg0: i32) -> (i32, i32) {
    %c0_i32 = arith.constant 0 : i32
    %c0_i32_0 = arith.constant 0 : i32
    %c0_i32_1 = arith.constant 0 : i32
    return %c0_i32, %c0_i32_0 : i32, i32
  }
  func.func @transform_2(%arg0: i32) -> (i32, i32) {
    %c0_i32 = arith.constant 0 : i32
    %c0_i32_0 = arith.constant 0 : i32
    %c0_i32_1 = arith.constant 0 : i32
    return %c0_i32, %c0_i32_0 : i32, i32
  }
  func.func @transform_3(%arg0: i32) -> (i32, i32) {
    %c0_i32 = arith.constant 0 : i32
    %c0_i32_0 = arith.constant 0 : i32
    %c0_i32_1 = arith.constant 0 : i32
    return %c0_i32, %c0_i32_0 : i32, i32
  }
  func.func @transform_4(%arg0: i32) -> (i32, i32) {
    %c0_i32 = arith.constant 0 : i32
    %c0_i32_0 = arith.constant 0 : i32
    %c0_i32_1 = arith.constant 0 : i32
    return %c0_i32, %c0_i32_0 : i32, i32
  }
  func.func @transform_5(%arg0: i32) -> (i32, i32) {
    %c0_i32 = arith.constant 0 : i32
    %c0_i32_0 = arith.constant 0 : i32
    %c0_i32_1 = arith.constant 0 : i32
    return %c0_i32, %c0_i32_0 : i32, i32
  }
  func.func @transform_6(%arg0: i32) -> (i32, i32) {
    %c0_i32 = arith.constant 0 : i32
    %c0_i32_0 = arith.constant 0 : i32
    %c0_i32_1 = arith.constant 0 : i32
    return %c0_i32, %c0_i32_0 : i32, i32
  }
  func.func @transform_7(%arg0: i32) -> (i32, i32) {
    %c0_i32 = arith.constant 0 : i32
    %c0_i32_0 = arith.constant 0 : i32
    %c0_i32_1 = arith.constant 0 : i32
    return %c0_i32, %c0_i32_0 : i32, i32
  }
  func.func @transform_8(%arg0: i32) -> (i32, i32) {
    %c0_i32 = arith.constant 0 : i32
    %c0_i32_0 = arith.constant 0 : i32
    %c0_i32_1 = arith.constant 0 : i32
    return %c0_i32, %c0_i32_0 : i32, i32
  }
  func.func @transform_9(%arg0: i32) -> (i32, i32) {
    %c0_i32 = arith.constant 0 : i32
    %c0_i32_0 = arith.constant 0 : i32
    return %arg0, %c0_i32 : i32, i32
  }
}

</mosaic_0001>

<bundles_post_ra>
// kernel: tpu_custom_call.1
= control target key start
LH: loop header
LB: loop body
LE: loop exit
PB: predicated region body
PF: predicated region fallthrough
CT: control target
= control target key end

     0   :  { %6 = vsyncpa [#allocation3], 0  ;;  %s125_s0 = inlined_call_operand.hbm [shape: f32[8,128], index: 0, kind: input, shape index: {}]   ;;  %s126_s1 = inlined_call_operand.hbm [shape: f32[8,128], index: 1, kind: output, shape index: {}]  }
   0x1   :  { %7 = vsyncpa [#allocation4], 0  ;;  %s89_s6 = smov [#allocation2]   ;;  %s41_s10 = scalar_lea.hbm %s125_s0, 128 }
   0x2   :  { %s14_s7 = sshll.u32 %s89_s6, 4  ;;  %p42_p0 = scmp.ne.s32.totalorder %s125_s0, %s41_s10  ;;  %s15_s7 = int_to_ptr.vmem [resolvable:$true] %s14_s7 }
   0x3   :  { %p45_p1 = scmp.lt.u32.totalorder %s41_s10, %s125_s0 }
   0x5   :  { %p47_p2 = pnand %p45_p1, %p42_p0 }
   0x7   :  { %50 = shalt.err (!%p47_p2)
}
   0x8   :  { %s51_s15 = scalar_lea.vmem %s15_s7, 128  ;;  %p56_p4 = scmp.lt.s32.totalorder %s15_s7, %s15_s7 }
   0x9   :  { %p52_p3 = scmp.ne.s32.totalorder %s15_s7, %s51_s15  ;;  %p57_p5 = scmp.lt.s32.totalorder %s51_s15, %s51_s15 }
   0xb   :  { %p58_p6 = por %p57_p5, %p56_p4 }
   0xd   :  { %p59_p7 = pnand %p58_p6, %p52_p3 }
   0xf   :  { %62 = shalt.err (!%p59_p7)
}
  0x10   :  { %17 = dma.hbm_to_vmem [thread:$0]  %s125_s0, 128, %s15_s7, [#allocation3]  }
  0x11   :  { %85 = dma.done.wait [#allocation3], 128  }
  0x12   :  { %86 = vsyncadd [#allocation3], 4294967168  ;;  %s90_s18 = smov [#allocation5]   ;;  %v21_v0 = vld [vmem:[#allocation2] sm:$0xff] }
  0x13   :  { %s30_s19 = sshll.u32 %s90_s18, 4  ;;  %v22_v1 = vadd.f32 1.0, %v21_v0  ;;  %s31_s19 = int_to_ptr.vmem [resolvable:$true] %s30_s19 }
  0x14   :  { %s63_s20 = scalar_lea.vmem %s31_s19, 128  ;;  %p68_p9 = scmp.lt.s32.totalorder %s31_s19, %s31_s19 }
  0x15   :  { %23 = vst [vmem:[#allocation5] sm:$0xff] %v22_v1  ;;  %p64_p8 = scmp.ne.s32.totalorder %s31_s19, %s63_s20  ;;  %p69_p10 = scmp.lt.s32.totalorder %s63_s20, %s63_s20 }
  0x17   :  { %p70_p11 = por %p69_p10, %p68_p9 }
  0x19   :  { %p71_p12 = pnand %p70_p11, %p64_p8 }
  0x1b   :  { %74 = shalt.err (!%p71_p12)
}
  0x1c   :  { %s75_s23 = scalar_lea.hbm %s126_s1, 128 }
  0x1d   :  { %p76_p13 = scmp.ne.s32.totalorder %s126_s1, %s75_s23  ;;  %p79_p0 = scmp.lt.u32.totalorder %s75_s23, %s126_s1 }
  0x1f   :  { %p81_p1 = pnand %p79_p0, %p76_p13 }
  0x21   :  { %84 = shalt.err (!%p81_p1)
}
  0x22   :  { %33 = dma.vmem_to_hbm [thread:$0]  %s31_s19, 128, %s126_s1, [#allocation4]  }
  0x23   :  { %87 = dma.done.wait [#allocation4], 128  }
  0x24   :  { %88 = vsyncadd [#allocation4], 4294967168 }
  0x25   :  { %37 = vsyncpa [#allocation3], 1 }
  0x26   :  { %38 = vsyncpa [#allocation4], 1 }

// kernel: tpu_custom_call.1
= control target key start
LH: loop header
LB: loop body
LE: loop exit
PB: predicated region body
PF: predicated region fallthrough
CT: control target
= control target key end

     0   :  { %14 = vsyncpa [#allocation3], 0  ;;  %s852_s0 = inlined_call_operand.vmem [shape: f32[8,16], index: 0, kind: input, shape index: {}]   ;;  %s853_s1 = inlined_call_operand.hbm [shape: bf16[16,128], index: 1, kind: input, shape index: {}]   ;;  %s854_s2 = inlined_call_operand.vmem [shape: f32[1,128], index: 2, kind: input, shape index: {}]   ;;  %s855_s3 = inlined_call_operand.vmem [shape: bf16[128,128], index: 3, kind: input, shape index: {}]   ;;  %s856_s4 = inlined_call_operand.vmem [shape: f32[1,128], index: 4, kind: input, shape index: {}]   ;;  %s857_s5 = inlined_call_operand.hbm [shape: bf16[128,128], index: 5, kind: input, shape index: {}]   ;;  %s858_s6 = inlined_call_operand.vmem [shape: f32[1,128], index: 6, kind: input, shape index: {}]   ;;  %s859_s7 = inlined_call_operand.vmem [shape: bf16[128,4], index: 7, kind: input, shape index: {}]   ;;  %s860_s8 = inlined_call_operand.vmem [shape: f32[1,4], index: 8, kind: input, shape index: {}]   ;;  %s861_s9 = inlined_call_operand.vmem [shape: f32[8,4], index: 9, kind: output, shape index: {}]  }
   0x1   :  { %15 = vsyncpa [#allocation5], 0  ;;  %s673_s30 = smov [#allocation2]   ;;  %s625_s13 = scalar_lea.hbm %s853_s1, 128 }
   0x2   :  { %s23_s10 = sshll.u32 %s673_s30, 4  ;;  %p626_p0 = scmp.ne.s32.totalorder %s853_s1, %s625_s13  ;;  %s24_s10 = int_to_ptr.vmem [resolvable:$true] %s23_s10 }
   0x3   :  { %p629_p1 = scmp.lt.u32.totalorder %s625_s13, %s853_s1 }
   0x5   :  { %p631_p2 = pnand %p629_p1, %p626_p0 }
   0x7   :  { %634 = shalt.err (!%p631_p2)
}
   0x8   :  { %s635_s18 = scalar_lea.vmem %s24_s10, 128  ;;  %p640_p4 = scmp.lt.s32.totalorder %s24_s10, %s24_s10 }
   0x9   :  { %p636_p3 = scmp.ne.s32.totalorder %s24_s10, %s635_s18  ;;  %p641_p5 = scmp.lt.s32.totalorder %s635_s18, %s635_s18 }
   0xb   :  { %p642_p6 = por %p641_p5, %p640_p4 }
   0xd   :  { %p643_p7 = pnand %p642_p6, %p636_p3 }
   0xf   :  { %646 = shalt.err (!%p643_p7)
}
  0x10   :  { %s674_s19 = smov 64   ;;  %s675_s20 = smov 4  }
  0x11   :  { %29 = dma.hbm_to_vmem [thread:$0]  %s853_s1, 128, %s24_s10, [#allocation3], %s674_s19, %s674_s19, %s675_s20  }
  0x12   :  { %s676_s23 = smov [#allocation4]   ;;  %s647_s27 = scalar_lea.hbm %s857_s5, 1024 }
  0x13   :  { %s41_s24 = sshll.u32 %s676_s23, 4  ;;  %p648_p8 = scmp.ne.s32.totalorder %s857_s5, %s647_s27  ;;  %s42_s24 = int_to_ptr.vmem [resolvable:$true] %s41_s24 }
  0x14   :  { %p651_p9 = scmp.lt.u32.totalorder %s647_s27, %s857_s5 }
  0x16   :  { %p653_p10 = pnand %p651_p9, %p648_p8 }
  0x18   :  { %656 = shalt.err (!%p653_p10)
}
  0x19   :  { %s657_s12 = scalar_lea.vmem %s42_s24, 1024  ;;  %p662_p12 = scmp.lt.s32.totalorder %s42_s24, %s42_s24 }
  0x1a   :  { %p658_p11 = scmp.ne.s32.totalorder %s42_s24, %s657_s12  ;;  %p663_p13 = scmp.lt.s32.totalorder %s657_s12, %s657_s12 }
  0x1c   :  { %p664_p0 = por %p663_p13, %p662_p12 }
  0x1e   :  { %p665_p1 = pnand %p664_p0, %p658_p11 }
  0x20   :  { %668 = shalt.err (!%p665_p1)
}
  0x21   :  { %47 = dma.hbm_to_vmem [thread:$0]  %s857_s5, 1024, %s42_s24, [#allocation5], %s674_s19, %s674_s19, %s675_s20  }
  0x22   :  { %669 = dma.done.wait [#allocation3], 128  }
  0x23   :  { %670 = vsyncadd [#allocation3], 4294967168 }
  0x24   :  { %671 = dma.done.wait [#allocation5], 1024  }
  0x25   :  { %672 = vsyncadd [#allocation5], 4294966272  ;;  %v677_v0 = vmov 0.0   ;;  %vm678_vm0 = vmmov 0   ;;  %v600_v1 = vld [vmem:[#allocation2] sm:$0xff]   ;;  %vm78_vm1 = vcmask 130048  }
  0x26   :  { %528 = vmatprep.subr.bf16.mxu0 %v677_v0  ;;  %530 = vmatprep.mubr.msk.bf16.mxu0 %vm678_vm0, %v677_v0  ;;  %v61_v2 = vld [vmem:[%s852_s0] sm:$0xff]  ;;  %v602_v5 = vld [vmem:[%s855_s3 + $0x8] sm:$0xff]   ;;  %v603_v6 = vld [vmem:[%s855_s3 + $0x10] sm:$0xff]   ;;  %vm461_vm2 = vcmask 31744  }
  0x27   :  { %534 = vmatprep.subr.bf16.mxu1 %v677_v0  ;;  %550 = vmatprep.mubr.msk.bf16.mxu1 %vm678_vm0, %v677_v0  ;;  %v62_v3 = vpack.c.bf16 %v61_v2, %v61_v2  ;;  %v601_v4 = vld [vmem:[%s855_s3] sm:$0xff]   ;;  %v604_v7 = vld [vmem:[%s855_s3 + $0x18] sm:$0xff]   ;;  %v606_v9 = vld [vmem:[%s855_s3 + $0x28] sm:$0xff]  }
  0x28   :  { %529 = vmatpush3.bf16.msra.mxu0 %v600_v1  ;;  %535 = vmatpush3.bf16.msra.mxu1 %v601_v4  ;;  %v605_v8 = vld [vmem:[%s855_s3 + $0x20] sm:$0xff]   ;;  %v607_v10 = vld [vmem:[%s855_s3 + $0x30] sm:$0xff]   ;;  %v608_v11 = vld [vmem:[%s855_s3 + $0x38] sm:$0xff]  }
  0x29   :  { %554 = vmatprep.subr.bf16.mxu0 %v677_v0  ;;  %536 = vmatprep.subr.bf16.mxu1 %v677_v0  ;;  %v609_v12 = vld [vmem:[#allocation4] sm:$0xff]   ;;  %v610_v13 = vld [vmem:[#allocation4 + $0x8] sm:$0xff]   ;;  %v611_v14 = vld [vmem:[#allocation4 + $0x10] sm:$0xff]  }
  0x2a   :  { %v612_v15 = vld [vmem:[#allocation4 + $0x18] sm:$0xff]   ;;  %v613_v16 = vld [vmem:[#allocation4 + $0x20] sm:$0xff]   ;;  %v614_v17 = vld [vmem:[#allocation4 + $0x28] sm:$0xff]  }
  0x2b   :  { %531 = vmatmul.mubr.msk.bf16.vlgmr.msra.gmra.mrb[0].mxu0 %vm78_vm1, %v62_v3  ;;  %v469_v18 = vld [vmem:[%s854_s2] ss:$0 sm:$0xff]  ;;  %v615_v26 = vld [vmem:[#allocation4 + $0x30] sm:$0xff]   ;;  %v618_v29 = vld [vmem:[%s859_s7 + $0x8] sm:$0xff]  }
  0x2c   :  { %570 = vmatprep.mubr.msk.bf16.mxu0 %vm678_vm0, %v677_v0  ;;  %537 = vmatpush3.bf16.msra.mxu1 %v602_v5  ;;  %v616_v27 = vld [vmem:[#allocation4 + $0x38] sm:$0xff]   ;;  %v619_v30 = vld [vmem:[%s859_s7 + $0x10] sm:$0xff]   ;;  %v620_v31 = vld [vmem:[%s859_s7 + $0x18] sm:$0xff]  }
  0x2d   :  { %538 = vmatprep.subr.bf16.mxu1 %v677_v0  ;;  %555 = vmatpush3.bf16.msra.mxu0 %v609_v12  ;;  %v617_v28 = vld [vmem:[%s859_s7] sm:$0xff]   ;;  %v622_v33 = vld [vmem:[%s859_s7 + $0x28] sm:$0xff]   ;;  %v623_v42 = vld [vmem:[%s859_s7 + $0x30] sm:$0xff]  }
  0x2e   :  { %556 = vmatprep.subr.bf16.mxu0 %v677_v0  ;;  %v621_v32 = vld [vmem:[%s859_s7 + $0x20] sm:$0xff]   ;;  %v624_v43 = vld [vmem:[%s859_s7 + $0x38] sm:$0xff]  }
  0x2f   :  { %v472_v34 = vld [vmem:[%s856_s4] ss:$0 sm:$0xff] }
  0x30   :  { %539 = vmatpush3.bf16.msra.mxu1 %v603_v6  ;;  %v481_v44 = vld [vmem:[%s858_s6] ss:$0 sm:$0xff] }
  0x31   :  { %540 = vmatprep.subr.bf16.mxu1 %v677_v0  ;;  %557 = vmatpush3.bf16.msra.mxu0 %v610_v13  ;;  %v490_v52 = vld [vmem:[%s860_s8] ss:$0 sm:$0xff] }
  0x32   :  { %558 = vmatprep.subr.bf16.mxu0 %v677_v0 }
  0x34   :  { %541 = vmatpush3.bf16.msra.mxu1 %v604_v7 }
  0x35   :  { %542 = vmatprep.subr.bf16.mxu1 %v677_v0  ;;  %559 = vmatpush3.bf16.msra.mxu0 %v611_v14 }
  0x36   :  { %560 = vmatprep.subr.bf16.mxu0 %v677_v0 }
  0x38   :  { %543 = vmatpush3.bf16.msra.mxu1 %v605_v8 }
  0x39   :  { %544 = vmatprep.subr.bf16.mxu1 %v677_v0  ;;  %561 = vmatpush3.bf16.msra.mxu0 %v612_v15 }
  0x3a   :  { %562 = vmatprep.subr.bf16.mxu0 %v677_v0 }
  0x3c   :  { %545 = vmatpush3.bf16.msra.mxu1 %v606_v9 }
  0x3d   :  { %546 = vmatprep.subr.bf16.mxu1 %v677_v0  ;;  %563 = vmatpush3.bf16.msra.mxu0 %v613_v16 }
  0x3e   :  { %564 = vmatprep.subr.bf16.mxu0 %v677_v0 }
  0x40   :  { %547 = vmatpush3.bf16.msra.mxu1 %v607_v10 }
  0x41   :  { %548 = vmatprep.subr.bf16.mxu1 %v677_v0  ;;  %565 = vmatpush3.bf16.msra.mxu0 %v614_v17 }
  0x42   :  { %566 = vmatprep.subr.bf16.mxu0 %v677_v0 }
  0x44   :  { %549 = vmatpush3.bf16.msra.mxu1 %v608_v11 }
  0x45   :  { %574 = vmatprep.subr.bf16.mxu1 %v677_v0  ;;  %567 = vmatpush3.bf16.msra.mxu0 %v615_v26 }
  0x46   :  { %568 = vmatprep.subr.bf16.mxu0 %v677_v0 }
  0x49   :  { %569 = vmatpush3.bf16.msra.mxu0 %v616_v27 }
  0xfe   :  { %v116_v19 = vpop.f32.mrb[0].mxu0 }
  0xff   :  { %v117_v20 = vadd.f32 %v469_v18, %v116_v19  ;;  %v532_v21 = vpop.f32.mrb[1].mxu0 }
 0x100   :  { %v119_v22 = vpop.f32.mrb[2].mxu0 }
 0x101   :  { %v122_v23 = vmax.f32 %v117_v20, 0.0  ;;  %v533_v24 = vpop.f32.mrb[3].mxu0 }
 0x103   :  { %v123_v25 = vpack.c.bf16 %v122_v23, %v122_v23 }
 0x105   :  { %551 = vmatmul.mubr.bf16.vlgmr.msra.gmra.mrb[0].mxu1 %v123_v25 }
 0x106   :  { %590 = vmatprep.mubr.msk.bf16.mxu1 %vm678_vm0, %v677_v0  ;;  %575 = vmatpush3.bf16.msra.mxu1 %v617_v28 }
 0x107   :  { %576 = vmatprep.subr.bf16.mxu1 %v677_v0 }
 0x10a   :  { %577 = vmatpush3.bf16.msra.mxu1 %v618_v29 }
 0x10b   :  { %578 = vmatprep.subr.bf16.mxu1 %v677_v0 }
 0x10e   :  { %579 = vmatpush3.bf16.msra.mxu1 %v619_v30 }
 0x10f   :  { %580 = vmatprep.subr.bf16.mxu1 %v677_v0 }
 0x112   :  { %581 = vmatpush3.bf16.msra.mxu1 %v620_v31 }
 0x113   :  { %582 = vmatprep.subr.bf16.mxu1 %v677_v0 }
 0x116   :  { %583 = vmatpush3.bf16.msra.mxu1 %v621_v32 }
 0x117   :  { %584 = vmatprep.subr.bf16.mxu1 %v677_v0 }
 0x11a   :  { %585 = vmatpush3.bf16.msra.mxu1 %v622_v33 }
 0x11b   :  { %586 = vmatprep.subr.bf16.mxu1 %v677_v0 }
 0x11e   :  { %587 = vmatpush3.bf16.msra.mxu1 %v623_v42 }
 0x11f   :  { %588 = vmatprep.subr.bf16.mxu1 %v677_v0 }
 0x122   :  { %589 = vmatpush3.bf16.msra.mxu1 %v624_v43 }
 0x1d8   :  { %v229_v35 = vpop.f32.mrb[0].mxu1 }
 0x1d9   :  { %v230_v36 = vadd.f32 %v472_v34, %v229_v35  ;;  %v552_v37 = vpop.f32.mrb[1].mxu1 }
 0x1da   :  { %v232_v38 = vpop.f32.mrb[2].mxu1 }
 0x1db   :  { %v235_v39 = vmax.f32 %v230_v36, 0.0  ;;  %v553_v40 = vpop.f32.mrb[3].mxu1 }
 0x1dd   :  { %v236_v41 = vpack.c.bf16 %v235_v39, %v235_v39 }
 0x1df   :  { %571 = vmatmul.mubr.bf16.vlgmr.msra.gmra.mrb[4].mxu0 %v236_v41 }
 0x2b2   :  { %v342_v45 = vpop.f32.mrb[4].mxu0 }
 0x2b3   :  { %v343_v46 = vadd.f32 %v481_v44, %v342_v45  ;;  %v572_v47 = vpop.f32.mrb[5].mxu0 }
 0x2b4   :  { %v345_v48 = vpop.f32.mrb[6].mxu0 }
 0x2b5   :  { %v348_v49 = vmax.f32 %v343_v46, 0.0  ;;  %v573_v50 = vpop.f32.mrb[7].mxu0 }
 0x2b7   :  { %v349_v51 = vpack.c.bf16 %v348_v49, %v348_v49 }
 0x2b9   :  { %591 = vmatmul.mubr.bf16.vlgmr.msra.gmra.mrb[4].mxu1 %v349_v51 }
 0x38c   :  { %v455_v53 = vpop.f32.mrb[4].mxu1 }
 0x38d   :  { %v456_v54 = vadd.f32 %v490_v52, %v455_v53  ;;  %v592_v55 = vpop.f32.mrb[5].mxu1 }
 0x38e   :  { %v458_v56 = vpop.f32.mrb[6].mxu1 }
 0x38f   :  { %462 = vst.msk [vmem:[%s861_s9] sm:$0xff] %vm461_vm2, %v456_v54  ;;  %v593_v57 = vpop.f32.mrb[7].mxu1 }
 0x390   :  { %467 = vsyncpa [#allocation3], 1 }
 0x391   :  { %468 = vsyncpa [#allocation5], 1 }

</bundles_post_ra>
